<compile_context>
chip_gen: v7x
topology: tpu7x:2x2x1
jax: 0.10.0
libtpu: 0.0.40
codegen_flags: <defaults>
</compile_context>

<pallas_src>
import jax
import jax.numpy as jnp
from jax.experimental import pallas as pl
from jax.experimental.pallas import tpu as pltpu


LANE = 128


def _round_up(v, m):
    return ((v + m - 1) // m) * m


def _vmem_spec():
    return pl.BlockSpec(memory_space=pltpu.MemorySpace.VMEM)


# ---------------------------------------------------------------------------
# Fused kernel: adjacency build + gcn_norm + GCN layer 1 + tanh
#               + GCN layer 2 + tanh + final Linear head.
# Everything is resident in VMEM; two lane-dense f32 outputs (x2, logits).
# ---------------------------------------------------------------------------

def _encoder_fused_kernel(src_ref, dst_ref, x_ref, w1_ref, b1_ref, w2_ref,
                          b2_ref, w3_ref, b3_ref, x2_ref, logits_ref):
    f32 = jnp.float32
    n = x_ref.shape[0]
    e = src_ref.shape[0]

    # ---- adjacency built in-kernel (no XLA scatter in the hot path) --------
    # One-hot masks via 2-D iota comparisons; duplicate edges accumulate.
    # A[i, j] = #edges with dst == i and src == j  (messages flow src -> dst).
    dst_onehot_t = (jax.lax.broadcasted_iota(jnp.int32, (n, e), 0)
                    == dst_ref[...]).astype(f32)                     # [n, e]
    src_onehot = (jax.lax.broadcasted_iota(jnp.int32, (e, n), 1)
                  == src_ref[...]).astype(f32)                       # [e, n]
    a = jnp.dot(dst_onehot_t, src_onehot, preferred_element_type=f32)  # [n, n]

    # Exactly one unit self-loop per node (PyG add_remaining_self_loops).
    eye = (jax.lax.broadcasted_iota(jnp.int32, (n, n), 0)
           == jax.lax.broadcasted_iota(jnp.int32, (n, n), 1)).astype(f32)
    a = a * (1.0 - eye) + eye

    # gcn_norm: deg counts incoming edges (incl. self-loop) -> D^{-1/2}.
    deg = jnp.sum(a, axis=1, keepdims=True)                          # [n, 1]
    d = jnp.where(deg > 0, jax.lax.rsqrt(deg), 0.0)                  # [n, 1]

    x = x_ref[...]                                                   # [n, Fin]

    # ---- layer 1: x1 = tanh((A_hat @ X) @ W1 + b1)
    # reassociated (Fin << 128); A_hat @ Z applied as d * (A @ (d * Z)).
    ax = jnp.dot(a, x * d, preferred_element_type=f32) * d           # [n, Fin]
    x1 = jnp.tanh(jnp.dot(ax, w1_ref[...], preferred_element_type=f32)
                  + b1_ref[...])                                     # [n, 128]

    # ---- layer 2: x2 = tanh(A_hat @ (x1 @ W2) + b2)  (W2/b2 padded to 128)
    z = jnp.dot(x1, w2_ref[...], preferred_element_type=f32)         # [n, 128]
    agg = jnp.dot(a, z * d, preferred_element_type=f32) * d
    x2 = jnp.tanh(agg + b2_ref[...])                                 # [n, 128]
    x2_ref[...] = x2

    # ---- head: logits = x2 @ W3 + b3  (W3/b3 padded; padded x2 cols are 0)
    logits_ref[...] = (jnp.dot(x2, w3_ref[...], preferred_element_type=f32)
                       + b3_ref[...])


# ---------------------------------------------------------------------------
# Params (stored kernel-ready: padded + reshaped ONCE, outside the hot path)
# ---------------------------------------------------------------------------

def init_params(key, input_len, dim, num_node_types, hidden=128):
    k1, k2, k3 = jax.random.split(key, 3)
    scale = 0.1
    dim_pad = _round_up(dim, LANE)
    out_pad = _round_up(num_node_types, LANE)
    w2 = jnp.zeros((hidden, dim_pad), jnp.float32).at[:, :dim].set(
        scale * jax.random.normal(k2, (hidden, dim), jnp.float32))
    w3 = jnp.zeros((dim_pad, out_pad), jnp.float32).at[:dim, :num_node_types].set(
        scale * jax.random.normal(k3, (dim, num_node_types), jnp.float32))
    return {
        # GCNConv(input_len, 128)
        "w1": scale * jax.random.normal(k1, (input_len, hidden), jnp.float32),
        "b1": jnp.zeros((1, hidden), jnp.float32),
        # GCNConv(128, dim) zero-padded to 128 output lanes
        "w2": w2,
        "b2": jnp.zeros((1, dim_pad), jnp.float32),
        # nn.Linear(dim, num_node_types), pre-transposed and zero-padded
        "w3": w3,
        "b3": jnp.zeros((1, out_pad), jnp.float32),
    }


# ---------------------------------------------------------------------------
# Forward wrapper (single pallas_call per forward)
# ---------------------------------------------------------------------------

def make_encoder_forward(dim, num_node_types):
    """Builds a jitted forward(params, x, edge_index) -> (x2, logits)."""

    @jax.jit
    def forward(params, x, edge_index):
        n, f_in = x.shape
        e = edge_index.shape[1]
        hidden = params["w1"].shape[1]
        dim_pad = params["w2"].shape[1]
        out_pad = params["w3"].shape[1]

        # Edge endpoints in the layouts the kernel's iota comparisons expect.
        src_col = edge_index[0].astype(jnp.int32).reshape(e, 1)
        dst_row = edge_index[1].astype(jnp.int32).reshape(1, e)

        flops = 2 * n * (e * n + n * f_in + f_in * hidden + hidden * dim_pad
                         + n * dim_pad + dim_pad * out_pad)
        transcendentals = n * (hidden + dim_pad + 1)
        bytes_accessed = 4 * (2 * e + n * f_in + f_in * hidden + hidden
                              + hidden * dim_pad + dim_pad + dim_pad * out_pad
                              + out_pad + n * dim_pad + n * out_pad)

        x2_pad, logits_pad = pl.pallas_call(
            _encoder_fused_kernel,
            out_shape=(
                jax.ShapeDtypeStruct((n, dim_pad), jnp.float32),
                jax.ShapeDtypeStruct((n, out_pad), jnp.float32),
            ),
            in_specs=[_vmem_spec()] * 9,
            out_specs=(_vmem_spec(), _vmem_spec()),
            cost_estimate=pl.CostEstimate(
                flops=flops,
                transcendentals=transcendentals,
                bytes_accessed=bytes_accessed,
            ),
        )(src_col, dst_row, x,
          params["w1"], params["b1"],
          params["w2"], params["b2"],
          params["w3"], params["b3"])

        return x2_pad[:, :dim], logits_pad[:, :num_node_types]

    return forward


# ---------------------------------------------------------------------------
# Main
# ---------------------------------------------------------------------------

if __name__ == "__main__":
    NUM_NODES = 16
    INPUT_LEN = 8
    DIM = 32
    NUM_NODE_TYPES = 4

    key = jax.random.PRNGKey(0)
    k_x, k_p = jax.random.split(key)

    # Node features [N, input_len]
    x = jax.random.normal(k_x, (NUM_NODES, INPUT_LEN), jnp.float32)

    # Deterministic small graph: bidirectional ring over 16 nodes.
    src = jnp.arange(NUM_NODES, dtype=jnp.int32)
    dst = (src + 1) % NUM_NODES
    edge_index = jnp.stack(
        [jnp.concatenate([src, dst]), jnp.concatenate([dst, src])], axis=0
    )  # [2, 2*N]

    params = init_params(k_p, INPUT_LEN, DIM, NUM_NODE_TYPES)
    encoder_forward = make_encoder_forward(DIM, NUM_NODE_TYPES)

    x2, logits = encoder_forward(params, x, edge_index)
    jax.block_until_ready((x2, logits))

    assert x2.shape == (NUM_NODES, DIM)
    assert logits.shape == (NUM_NODES, NUM_NODE_TYPES)
    assert bool(jnp.all(jnp.isfinite(x2))) and bool(jnp.all(jnp.isfinite(logits)))
    print("KERNEL_OK")
</pallas_src>

<mosaic_0001>
module attributes {stable_mosaic.version = 11 : i64} {
  func.func @_encoder_fused_kernel(%arg0: memref<32x1xi32, #tpu.memory_space<vmem>>, %arg1: memref<1x32xi32, #tpu.memory_space<vmem>>, %arg2: memref<16x8xf32, #tpu.memory_space<vmem>>, %arg3: memref<8x128xf32, #tpu.memory_space<vmem>>, %arg4: memref<1x128xf32, #tpu.memory_space<vmem>>, %arg5: memref<128x128xf32, #tpu.memory_space<vmem>>, %arg6: memref<1x128xf32, #tpu.memory_space<vmem>>, %arg7: memref<128x128xf32, #tpu.memory_space<vmem>>, %arg8: memref<1x128xf32, #tpu.memory_space<vmem>>, %arg9: memref<16x128xf32, #tpu.memory_space<vmem>>, %arg10: memref<16x128xf32, #tpu.memory_space<vmem>>) attributes {dimension_semantics = [], scalar_prefetch = 0 : i64, scratch_operands = 0 : i64, tpu.core_type = #tpu.core_type<tc>} {
    %0 = tpu.iota {dimensions = array<i32: 0>} : vector<16x32xi32>
    %c0 = arith.constant 0 : index
    %c0_0 = arith.constant 0 : index
    %1 = vector.load %arg1[%c0, %c0_0] : memref<1x32xi32, #tpu.memory_space<vmem>>, vector<1x32xi32>
    %2 = vector.broadcast %1 : vector<1x32xi32> to vector<16x32xi32>
    %3 = arith.cmpi eq, %0, %2 : vector<16x32xi32>
    %4 = arith.extui %3 : vector<16x32xi1> to vector<16x32xi32>
    %5 = arith.sitofp %4 : vector<16x32xi32> to vector<16x32xf32>
    %6 = tpu.iota {dimensions = array<i32: 1>} : vector<32x16xi32>
    %c0_1 = arith.constant 0 : index
    %c0_2 = arith.constant 0 : index
    %7 = vector.load %arg0[%c0_1, %c0_2] : memref<32x1xi32, #tpu.memory_space<vmem>>, vector<32x1xi32>
    %8 = vector.broadcast %7 : vector<32x1xi32> to vector<32x16xi32>
    %9 = arith.cmpi eq, %6, %8 : vector<32x16xi32>
    %10 = arith.extui %9 : vector<32x16xi1> to vector<32x16xi32>
    %11 = arith.sitofp %10 : vector<32x16xi32> to vector<32x16xf32>
    %cst = arith.constant dense<0.000000e+00> : vector<16x16xf32>
    %12 = tpu.matmul %5, %11, %cst {dimension_numbers = #tpu.dot_dimension_numbers<[1], [0], [0], [1], [0, 0, 1, 1], [], []>} : vector<16x32xf32>, vector<32x16xf32>, vector<16x16xf32> -> vector<16x16xf32>
    %13 = tpu.iota {dimensions = array<i32: 0>} : vector<16x16xi32>
    %14 = tpu.iota {dimensions = array<i32: 1>} : vector<16x16xi32>
    %15 = arith.cmpi eq, %13, %14 : vector<16x16xi32>
    %16 = arith.extui %15 : vector<16x16xi1> to vector<16x16xi32>
    %17 = arith.sitofp %16 : vector<16x16xi32> to vector<16x16xf32>
    %cst_3 = arith.constant 1.000000e+00 : f32
    %18 = vector.broadcast %cst_3 : f32 to vector<16x16xf32>
    %19 = arith.subf %18, %17 : vector<16x16xf32>
    %20 = arith.mulf %12, %19 : vector<16x16xf32>
    %21 = arith.addf %20, %17 : vector<16x16xf32>
    %cst_4 = arith.constant dense<0.000000e+00> : vector<16xf32>
    %22 = vector.multi_reduction <add>, %21, %cst_4 [1] : vector<16x16xf32> to vector<16xf32>
    %23 = vector.shape_cast %22 : vector<16xf32> to vector<16x1xf32>
    %cst_5 = arith.constant 0.000000e+00 : f32
    %24 = vector.broadcast %cst_5 : f32 to vector<16x1xf32>
    %25 = arith.cmpf ogt, %23, %24 : vector<16x1xf32>
    %26 = math.rsqrt %23 : vector<16x1xf32>
    %cst_6 = arith.constant 0.000000e+00 : f32
    %27 = vector.broadcast %cst_6 : f32 to vector<16x1xf32>
    %28 = arith.select %25, %26, %27 : vector<16x1xi1>, vector<16x1xf32>
    %c0_7 = arith.constant 0 : index
    %c0_8 = arith.constant 0 : index
    %29 = vector.load %arg2[%c0_7, %c0_8] : memref<16x8xf32, #tpu.memory_space<vmem>>, vector<16x8xf32>
    %30 = vector.broadcast %28 : vector<16x1xf32> to vector<16x8xf32>
    %31 = arith.mulf %29, %30 : vector<16x8xf32>
    %cst_9 = arith.constant dense<0.000000e+00> : vector<16x8xf32>
    %32 = tpu.matmul %21, %31, %cst_9 {dimension_numbers = #tpu.dot_dimension_numbers<[1], [0], [0], [1], [0, 0, 1, 1], [], []>} : vector<16x16xf32>, vector<16x8xf32>, vector<16x8xf32> -> vector<16x8xf32>
    %33 = vector.broadcast %28 : vector<16x1xf32> to vector<16x8xf32>
    %34 = arith.mulf %32, %33 : vector<16x8xf32>
    %c0_10 = arith.constant 0 : index
    %c0_11 = arith.constant 0 : index
    %35 = vector.load %arg3[%c0_10, %c0_11] : memref<8x128xf32, #tpu.memory_space<vmem>>, vector<8x128xf32>
    %cst_12 = arith.constant dense<0.000000e+00> : vector<16x128xf32>
    %36 = tpu.matmul %34, %35, %cst_12 {dimension_numbers = #tpu.dot_dimension_numbers<[1], [0], [0], [1], [0, 0, 1, 1], [], []>} : vector<16x8xf32>, vector<8x128xf32>, vector<16x128xf32> -> vector<16x128xf32>
    %c0_13 = arith.constant 0 : index
    %c0_14 = arith.constant 0 : index
    %37 = vector.load %arg4[%c0_13, %c0_14] : memref<1x128xf32, #tpu.memory_space<vmem>>, vector<1x128xf32>
    %38 = vector.broadcast %37 : vector<1x128xf32> to vector<16x128xf32>
    %39 = arith.addf %36, %38 : vector<16x128xf32>
    %40 = math.tanh %39 : vector<16x128xf32>
    %c0_15 = arith.constant 0 : index
    %c0_16 = arith.constant 0 : index
    %41 = vector.load %arg5[%c0_15, %c0_16] : memref<128x128xf32, #tpu.memory_space<vmem>>, vector<128x128xf32>
    %cst_17 = arith.constant dense<0.000000e+00> : vector<16x128xf32>
    %42 = tpu.matmul %40, %41, %cst_17 {dimension_numbers = #tpu.dot_dimension_numbers<[1], [0], [0], [1], [0, 0, 1, 1], [], []>} : vector<16x128xf32>, vector<128x128xf32>, vector<16x128xf32> -> vector<16x128xf32>
    %43 = vector.broadcast %28 : vector<16x1xf32> to vector<16x128xf32>
    %44 = arith.mulf %42, %43 : vector<16x128xf32>
    %cst_18 = arith.constant dense<0.000000e+00> : vector<16x128xf32>
    %45 = tpu.matmul %21, %44, %cst_18 {dimension_numbers = #tpu.dot_dimension_numbers<[1], [0], [0], [1], [0, 0, 1, 1], [], []>} : vector<16x16xf32>, vector<16x128xf32>, vector<16x128xf32> -> vector<16x128xf32>
    %46 = vector.broadcast %28 : vector<16x1xf32> to vector<16x128xf32>
    %47 = arith.mulf %45, %46 : vector<16x128xf32>
    %c0_19 = arith.constant 0 : index
    %c0_20 = arith.constant 0 : index
    %48 = vector.load %arg6[%c0_19, %c0_20] : memref<1x128xf32, #tpu.memory_space<vmem>>, vector<1x128xf32>
    %49 = vector.broadcast %48 : vector<1x128xf32> to vector<16x128xf32>
    %50 = arith.addf %47, %49 : vector<16x128xf32>
    %51 = math.tanh %50 : vector<16x128xf32>
    %c0_21 = arith.constant 0 : index
    %c0_22 = arith.constant 0 : index
    %52 = vector.load %arg9[%c0_21, %c0_22] : memref<16x128xf32, #tpu.memory_space<vmem>>, vector<16x128xf32>
    tpu.vector_store %arg9[%c0_21, %c0_22], %51 {strides = array<i32>} : memref<16x128xf32, #tpu.memory_space<vmem>>, vector<16x128xf32>,
    %c0_23 = arith.constant 0 : index
    %c0_24 = arith.constant 0 : index
    %53 = vector.load %arg7[%c0_23, %c0_24] : memref<128x128xf32, #tpu.memory_space<vmem>>, vector<128x128xf32>
    %cst_25 = arith.constant dense<0.000000e+00> : vector<16x128xf32>
    %54 = tpu.matmul %51, %53, %cst_25 {dimension_numbers = #tpu.dot_dimension_numbers<[1], [0], [0], [1], [0, 0, 1, 1], [], []>} : vector<16x128xf32>, vector<128x128xf32>, vector<16x128xf32> -> vector<16x128xf32>
    %c0_26 = arith.constant 0 : index
    %c0_27 = arith.constant 0 : index
    %55 = vector.load %arg8[%c0_26, %c0_27] : memref<1x128xf32, #tpu.memory_space<vmem>>, vector<1x128xf32>
    %56 = vector.broadcast %55 : vector<1x128xf32> to vector<16x128xf32>
    %57 = arith.addf %54, %56 : vector<16x128xf32>
    %c0_28 = arith.constant 0 : index
    %c0_29 = arith.constant 0 : index
    %58 = vector.load %arg10[%c0_28, %c0_29] : memref<16x128xf32, #tpu.memory_space<vmem>>, vector<16x128xf32>
    tpu.vector_store %arg10[%c0_28, %c0_29], %57 {strides = array<i32>} : memref<16x128xf32, #tpu.memory_space<vmem>>, vector<16x128xf32>,
    return
  }
}

</mosaic_0001>

<bundles_post_ra>
// kernel: forward.1
= control target key start
LH: loop header
LB: loop body
LE: loop exit
PB: predicated region body
PF: predicated region fallthrough
CT: control target
= control target key end

     0   :  { %16 = vsyncpa [#allocation3], 0  ;;  %s1221_s0 = inlined_call_operand.vmem [shape: s32[32,1], index: 0, kind: input, shape index: {}]   ;;  %s1222_s1 = inlined_call_operand.vmem [shape: s32[1,32], index: 1, kind: input, shape index: {}]   ;;  %s1223_s2 = inlined_call_operand.vmem [shape: f32[16,8], index: 2, kind: input, shape index: {}]   ;;  %s1224_s3 = inlined_call_operand.vmem [shape: f32[8,128], index: 3, kind: input, shape index: {}]   ;;  %s1225_s4 = inlined_call_operand.vmem [shape: f32[1,128], index: 4, kind: input, shape index: {}]   ;;  %s1226_s5 = inlined_call_operand.hbm [shape: f32[128,128], index: 5, kind: input, shape index: {}]   ;;  %s1227_s6 = inlined_call_operand.vmem [shape: f32[1,128], index: 6, kind: input, shape index: {}]   ;;  %s1228_s7 = inlined_call_operand.hbm [shape: f32[128,128], index: 7, kind: input, shape index: {}]   ;;  %s1229_s8 = inlined_call_operand.vmem [shape: f32[1,128], index: 8, kind: input, shape index: {}]   ;;  %s1230_s9 = inlined_call_operand.hbm [shape: f32[16,128], index: 9, kind: output, shape index: {0}]   ;;  %s1231_s10 = inlined_call_operand.vmem [shape: f32[16,128], index: 10, kind: output, shape index: {1}]  }
   0x1   :  { %17 = vsyncpa [#allocation6], 0 }
   0x2   :  { %18 = vsyncpa [#allocation4], 0  ;;  %s1049_s13 = smov [#allocation2]   ;;  %s977_s17 = scalar_lea.hbm %s1226_s5, 2048 }
   0x3   :  { %s34_s14 = sshll.u32 %s1049_s13, 4  ;;  %p978_p0 = scmp.ne.s32.totalorder %s1226_s5, %s977_s17  ;;  %s35_s14 = int_to_ptr.vmem [resolvable:$true] %s34_s14 }
   0x4   :  { %p981_p1 = scmp.lt.u32.totalorder %s977_s17, %s1226_s5 }
   0x6   :  { %p983_p2 = pnand %p981_p1, %p978_p0 }
   0x8   :  { %986 = shalt.err (!%p983_p2)
}
   0x9   :  { %s987_s22 = scalar_lea.vmem %s35_s14, 2048  ;;  %p992_p4 = scmp.lt.s32.totalorder %s35_s14, %s35_s14 }
   0xa   :  { %p988_p3 = scmp.ne.s32.totalorder %s35_s14, %s987_s22  ;;  %p993_p5 = scmp.lt.s32.totalorder %s987_s22, %s987_s22 }
   0xc   :  { %p994_p6 = por %p993_p5, %p992_p4 }
   0xe   :  { %p995_p7 = pnand %p994_p6, %p988_p3 }
  0x10   :  { %998 = shalt.err (!%p995_p7)
}
  0x11   :  { %s1050_s23 = smov 128   ;;  %s1051_s24 = smov 8  }
  0x12   :  { %40 = dma.hbm_to_vmem [thread:$0]  %s1226_s5, 2048, %s35_s14, [#allocation3], %s1050_s23, %s1050_s23, %s1051_s24  }
  0x13   :  { %s1052_s27 = smov [#allocation5]   ;;  %s999_s11 = scalar_lea.hbm %s1228_s7, 2048 }
  0x14   :  { %s48_s28 = sshll.u32 %s1052_s27, 4  ;;  %p1000_p8 = scmp.ne.s32.totalorder %s1228_s7, %s999_s11  ;;  %s49_s28 = int_to_ptr.vmem [resolvable:$true] %s48_s28 }
  0x15   :  { %p1003_p9 = scmp.lt.u32.totalorder %s999_s11, %s1228_s7 }
  0x17   :  { %p1005_p10 = pnand %p1003_p9, %p1000_p8 }
  0x19   :  { %1008 = shalt.err (!%p1005_p10)
}
  0x1a   :  { %s1009_s17 = scalar_lea.vmem %s49_s28, 2048  ;;  %p1014_p12 = scmp.lt.s32.totalorder %s49_s28, %s49_s28 }
  0x1b   :  { %p1010_p11 = scmp.ne.s32.totalorder %s49_s28, %s1009_s17  ;;  %p1015_p13 = scmp.lt.s32.totalorder %s1009_s17, %s1009_s17 }
  0x1d   :  { %p1016_p0 = por %p1015_p13, %p1014_p12 }
  0x1f   :  { %p1017_p1 = pnand %p1016_p0, %p1010_p11 }
  0x21   :  { %1020 = shalt.err (!%p1017_p1)
}
  0x22   :  { %54 = dma.hbm_to_vmem [thread:$0]  %s1228_s7, 2048, %s49_s28, [#allocation6], %s1050_s23, %s1050_s23, %s1051_s24  }
  0x23   :  { %1043 = dma.done.wait [#allocation3], 2048  }
  0x24   :  { %1044 = vsyncadd [#allocation3], 4294965248 }
  0x25   :  { %1045 = dma.done.wait [#allocation6], 2048  }
  0x26   :  { %1046 = vsyncadd [#allocation6], 4294965248  ;;  %v1053_v0 = vmov 0   ;;  %v81_v1 = vld [vmem:[%s1221_s0 + $0x10] sm:$0xff]  ;;  %v79_v2 = vld [vmem:[%s1221_s0] sm:$0xff]  ;;  %v63_v5 = vlaneseq  ;;  %vm107_vm1 = vcmask 261120  }
  0x27   :  { %964 = vset.pattern.permute.xlu1 %v1053_v0  ;;  %963 = vset.pattern.permute.xlu0 %v1053_v0  ;;  %v82_v3 = vld [vmem:[%s1221_s0 + $0x18] sm:$0xff]  ;;  %v80_v4 = vld [vmem:[%s1221_s0 + $0x8] sm:$0xff]  ;;  %v698_v7 = vld [vmem:[%s1222_s1] ss:$0 sm:$0xff]  ;;  %v1054_v8 = vmov 0.0   ;;  %vm201_vm11 = vcmask 130048  }
  0x28   :  { %90 = vperm.xlu1 %964, %v81_v1   ;;  %84 = vperm.xlu0 %963, %v79_v2   ;;  %v64_v6 = vshrl.u32 %v63_v5, 7  ;;  %v78_v12 = vand.u32 127, %v63_v5  ;;  %v1055_v16 = vmov 1.0|1.0   ;;  %v215_v32 = vld [vmem:[%s1223_s2 + $0x8] sm:$0xff]  ;;  %v214_v34 = vld [vmem:[%s1223_s2] sm:$0xff] }
  0x29   :  { %v301_v41 = vld [vmem:[%s1224_s3] sm:$0xff]  ;;  %v394_v43 = vld [vmem:[#allocation2 + $0x8] sm:$0xff]  ;;  %v395_v44 = vld [vmem:[#allocation2 + $0x10] sm:$0xff]  ;;  %vm309_vm14 = vcmask 64512   ;;  %s1056_s15 = smov [#allocation7]  }
  0x2a   :  { %vm71_vm0 = vcmp.eq.s32.totalorder %v64_v6, %v698_v7  ;;  %v65_v15 = vadd.s32 8, %v64_v6  ;;  %vm189_vm10 = vcmp.eq.s32.totalorder %v64_v6, %v78_v12  ;;  %v393_v42 = vld [vmem:[#allocation2] sm:$0xff]  ;;  %v396_v46 = vld [vmem:[#allocation2 + $0x18] sm:$0xff]  ;;  %v398_v49 = vld [vmem:[#allocation2 + $0x28] sm:$0xff]  ;;  %s681_s16 = sshll.u32 %s1056_s15, 4  ;;  %s682_s16 = int_to_ptr.vmem [resolvable:$true] %s681_s16 }
  0x2b   :  { %v699_v9 = vsel %vm71_vm0, 1.0, %v1054_v8  ;;  %v711_v19 = vsel %vm189_vm10, 1.0, %v1054_v8  ;;  %v887_v45 = vpack.c.bf16 %v394_v43, %v393_v42  ;;  %v891_v47 = vpack.c.bf16 %v396_v46, %v395_v44  ;;  %v397_v48 = vld [vmem:[#allocation2 + $0x20] sm:$0xff]  ;;  %v399_v51 = vld [vmem:[#allocation2 + $0x30] sm:$0xff]  ;;  %v400_v52 = vld [vmem:[#allocation2 + $0x38] sm:$0xff]  ;;  %s1021_s17 = scalar_lea.vmem %s682_s16, 256  ;;  %p1026_p3 = scmp.lt.s32.totalorder %s682_s16, %s682_s16 }
  0x2c   :  { %93 = vperm.xlu1 %964, %v82_v3   ;;  %87 = vperm.xlu0 %963, %v80_v4   ;;  %vm72_vm8 = vcmp.eq.s32.totalorder %v65_v15, %v698_v7  ;;  %vm190_vm9 = vcmp.eq.s32.totalorder %v65_v15, %v78_v12  ;;  %v195_v21 = vsub.f32 1.0, %v711_v19  ;;  %v895_v50 = vpack.c.bf16 %v398_v49, %v397_v48  ;;  %v401_v58 = vld [vmem:[#allocation2 + $0x40] sm:$0xff]  ;;  %v402_v59 = vld [vmem:[#allocation2 + $0x48] sm:$0xff]  ;;  %v403_v61 = vld [vmem:[#allocation2 + $0x50] sm:$0xff]  ;;  %p1022_p2 = scmp.ne.s32.totalorder %s682_s16, %s1021_s17  ;;  %p1027_p4 = scmp.lt.s32.totalorder %s1021_s17, %s1021_s17 }
  0x2d   :  { %783 = vmatprep.mubr.msk.f32.mxu0 %vm107_vm1, %v699_v9  ;;  %v700_v17 = vsel %vm72_vm8, 1.0, %v1054_v8  ;;  %v712_v18 = vsel %vm190_vm9, 1.0, %v1054_v8  ;;  %v899_v53 = vpack.c.bf16 %v400_v52, %v399_v51  ;;  %v903_v60 = vpack.c.bf16 %v402_v59, %v401_v58  ;;  %v404_v62 = vld [vmem:[#allocation2 + $0x58] sm:$0xff]  ;;  %v405_v0 = vld [vmem:[#allocation2 + $0x60] sm:$0xff]  ;;  %v406_v1 = vld [vmem:[#allocation2 + $0x68] sm:$0xff] }
  0x2e   :  { %v196_v20 = vsub.f32 1.0, %v712_v18  ;;  %v907_v63 = vpack.c.bf16 %v404_v62, %v403_v61  ;;  %v407_v2 = vld [vmem:[#allocation2 + $0x70] sm:$0xff]  ;;  %v911_v3 = vpack.c.bf16 %v406_v1, %v405_v0  ;;  %v408_v4 = vld [vmem:[#allocation2 + $0x78] sm:$0xff]  ;;  %v715_v6 = vld [vmem:[%s1225_s4] ss:$0 sm:$0xff]  ;;  %p1028_p5 = por %p1027_p4, %p1026_p3 }
  0x2f   :  { %v915_v5 = vpack.c.bf16 %v408_v4, %v407_v2  ;;  %v591_v42 = vld [vmem:[#allocation5 + $0x78] sm:$0xff] }
  0x30   :  { %p1029_p6 = pnand %p1028_p5, %p1022_p2 }
  0xa7   :  { %v91_v10 = vpop.permute.xlu1 %90  ;;  %v85_v11 = vpop.permute.xlu0 %84 }
  0xa8   :  { %vm97_vm3 = vcmp.eq.s32.totalorder %v78_v12, %v91_v10  ;;  %vm95_vm4 = vcmp.eq.s32.totalorder %v78_v12, %v85_v11 }
  0xab   :  { %v94_v13 = vpop.permute.xlu1 %93  ;;  %v88_v14 = vpop.permute.xlu0 %87 }
  0xac   :  { %vm96_vm2 = vcmp.eq.s32.totalorder %v78_v12, %v88_v14  ;;  %vm98_vm5 = vcmp.eq.s32.totalorder %v78_v12, %v94_v13 }
  0xad   :  { %vm875_vm6 = vmpackc.low %vm96_vm2, %vm95_vm4 }
  0xae   :  { %876 = vmatprep.subr.msk.bf16.mxu0 %vm875_vm6, %v1055_v16  ;;  %vm879_vm7 = vmpackc.low %vm98_vm5, %vm97_vm3 }
  0xaf   :  { %878 = vmatpush3.bf16.msk.msra.mxu0 %vm875_vm6, %v1055_v16 }
  0xb0   :  { %880 = vmatprep.subr.msk.bf16.mxu0 %vm879_vm7, %v1055_v16 }
  0xb3   :  { %882 = vmatpush3.bf16.msk.msra.mxu0 %vm879_vm7, %v1055_v16  ;;  %v576_v16 = vld [vmem:[#allocation5] sm:$0xff] }
  0xb4   :  { %888 = vmatprep.subr.bf16.mxu0 %v887_v45 }
  0xb6   :  { %784 = vmatmul.mubr.msk.f32.vlgmr.msra.gmra.mrb[0].mxu0 %vm107_vm1, %v700_v17  ;;  %v577_v17 = vld [vmem:[#allocation5 + $0x8] sm:$0xff] }
  0xb7   :  { %890 = vmatpush3.bf16.msra.mxu0 %v887_v45  ;;  %v720_v45 = vld [vmem:[%s1227_s6] ss:$0 sm:$0xff] }
  0xb8   :  { %892 = vmatprep.subr.bf16.mxu0 %v891_v47 }
  0xbb   :  { %894 = vmatpush3.bf16.msra.mxu0 %v891_v47 }
  0xbc   :  { %896 = vmatprep.subr.bf16.mxu0 %v895_v50 }
  0xbf   :  { %898 = vmatpush3.bf16.msra.mxu0 %v895_v50 }
  0xc0   :  { %900 = vmatprep.subr.bf16.mxu0 %v899_v53 }
  0xc3   :  { %902 = vmatpush3.bf16.msra.mxu0 %v899_v53 }
  0xc4   :  { %904 = vmatprep.subr.bf16.mxu0 %v903_v60 }
  0xc7   :  { %906 = vmatpush3.bf16.msra.mxu0 %v903_v60 }
  0xc8   :  { %908 = vmatprep.subr.bf16.mxu0 %v907_v63 }
  0xcb   :  { %910 = vmatpush3.bf16.msra.mxu0 %v907_v63 }
  0xcc   :  { %912 = vmatprep.subr.bf16.mxu0 %v911_v3 }
  0xcf   :  { %914 = vmatpush3.bf16.msra.mxu0 %v911_v3 }
  0xd0   :  { %916 = vmatprep.subr.bf16.mxu0 %v915_v5 }
  0xd3   :  { %918 = vmatpush3.bf16.msra.mxu0 %v915_v5 }
 0x189   :  { %v785_v22 = vpop.f32.mrb[0].mxu0 }
 0x18a   :  { %v198_v23 = vmul.f32 %v785_v22, %v196_v20  ;;  %v180_v24 = vpop.f32.mrb[1].mxu0  ;;  %v923_v20 = vpack.c.bf16 %v577_v17, %v576_v16  ;;  %v579_v22 = vld [vmem:[#allocation5 + $0x18] sm:$0xff] }
 0x18b   :  { %v197_v25 = vmul.f32 %v195_v21, %v180_v24  ;;  %v578_v21 = vld [vmem:[#allocation5 + $0x10] sm:$0xff]  ;;  %v580_v24 = vld [vmem:[#allocation5 + $0x20] sm:$0xff] }
 0x18c   :  { %v1159_v26 = vadd.f32 %v712_v18, %v198_v23  ;;  %v927_v23 = vpack.c.bf16 %v579_v22, %v578_v21 }
 0x18d   :  { %v199_v27 = vadd.f32 %v711_v19, %v197_v25  ;;  %v581_v25 = vld [vmem:[#allocation5 + $0x28] sm:$0xff] }
 0x18e   :  { %v205_v28 = vsel %vm201_vm11, %v1159_v26, 0.0 }
 0x18f   :  { %206 = vadd.xlane.f32.xlu1 %v205_v28  ;;  %790 = vmatprep.mubr.msk.f32.mxu1 %vm201_vm11, %v199_v27  ;;  %v202_v29 = vsel %vm201_vm11, %v199_v27, 0.0  ;;  %v582_v28 = vld [vmem:[#allocation5 + $0x30] sm:$0xff] }
 0x190   :  { %203 = vadd.xlane.f32.xlu0 %v202_v29  ;;  %v583_v29 = vld [vmem:[#allocation5 + $0x38] sm:$0xff] }
 0x21c   :  { %v207_v30 = vpop.xlane.xlu1 %206 }
 0x21d   :  { %965 = vrsqrt.f32 %v207_v30  ;;  %v204_v31 = vpop.xlane.xlu0 %203  ;;  %vm209_vm12 = vcmp.gt.f32.partialorder %v207_v30, 0.0  ;;  %v935_v30 = vpack.c.bf16 %v583_v29, %v582_v28 }
 0x21e   :  { %967 = vrsqrt.f32 %v204_v31  ;;  %vm208_vm13 = vcmp.gt.f32.partialorder %v204_v31, 0.0  ;;  %v584_v31 = vld [vmem:[#allocation5 + $0x40] sm:$0xff] }
 0x227   :  { %v966_v33 = vpop.eup %965 }
 0x228   :  { %v968_v35 = vpop.eup %967  ;;  %v1171_v36 = vsel %vm209_vm12, %v966_v33, 0.0 }
 0x229   :  { %v1173_v37 = vsel %vm208_vm13, %v968_v35, 0.0  ;;  %v217_v38 = vmul.f32 %v215_v32, %v1171_v36  ;;  %v585_v32 = vld [vmem:[#allocation5 + $0x48] sm:$0xff]  ;;  %v587_v35 = vld [vmem:[#allocation5 + $0x58] sm:$0xff] }
 0x22a   :  { %v216_v39 = vmul.f32 %v214_v34, %v1173_v37  ;;  %v939_v33 = vpack.c.bf16 %v585_v32, %v584_v31  ;;  %v586_v34 = vld [vmem:[#allocation5 + $0x50] sm:$0xff] }
 0x22c   :  { %v883_v40 = vpack.c.bf16 %v217_v38, %v216_v39  ;;  %v943_v38 = vpack.c.bf16 %v587_v35, %v586_v34  ;;  %v589_v39 = vld [vmem:[#allocation5 + $0x68] sm:$0xff] }
 0x22e   :  { %884 = vmatprep.subr.bf16.mxu1 %v883_v40 }
 0x22f   :  { %886 = vmatpush3.bf16.msra.mxu1 %v883_v40 }
 0x230   :  { %793 = vmatprep.subr.mxu1 %v301_v41 }
 0x232   :  { %791 = vmatmul.mubr.msk.f32.vlgmr.msra.gmra.mrb[0].mxu1 %vm201_vm11, %v1159_v26 }
 0x233   :  { %794 = vmatpush3.msra.mxu1 %v301_v41  ;;  %v590_v41 = vld [vmem:[#allocation5 + $0x70] sm:$0xff] }
 0x234   :  { %v951_v43 = vpack.c.bf16 %v591_v42, %v590_v41 }
 0x305   :  { %v792_v54 = vpop.f32.mrb[0].mxu1 }
 0x306   :  { %v290_v55 = vpop.f32.mrb[1].mxu1  ;;  %v300_v57 = vmul.f32 %v792_v54, %v1171_v36 }
 0x307   :  { %v299_v56 = vmul.f32 %v290_v55, %v1173_v37 }
 0x309   :  { %795 = vmatprep.mubr.msk.f32.mxu1 %vm309_vm14, %v299_v56 }
 0x30a   :  { %796 = vmatmul.mubr.msk.f32.vlgmr.msra.gmra.mrb[2].mxu1 %vm309_vm14, %v300_v57 }
 0x30b   :  { %837 = vmatprep.mubr.msk.f32.mxu1 %vm201_vm11, %v199_v27  ;;  %v931_v27 = vpack.c.bf16 %v581_v25, %v580_v24 }
 0x3dd   :  { %v797_v7 = vpop.f32.mrb[2].mxu1 }
 0x3de   :  { %v388_v8 = vadd.f32 %v797_v7, %v715_v6  ;;  %v382_v9 = vpop.f32.mrb[3].mxu1 }
 0x3df   :  { %v383_v10 = vadd.f32 %v715_v6, %v382_v9 }
 0x3e1   :  { %969 = vtanh.f32 %v383_v10 }
 0x3e2   :  { %971 = vtanh.f32 %v388_v8 }
 0x3eb   :  { %v970_v11 = vpop.eup %969 }
 0x3ec   :  { %v972_v12 = vpop.eup %971  ;;  %830 = vmatprep.mubr.f32.mxu0 %v970_v11 }
 0x3ed   :  { %831 = vmatmul.mubr.f32.vlgmr.msra.gmra.mrb[2].mxu0 %v972_v12 }
 0x4c0   :  { %v832_v13 = vpop.f32.mrb[2].mxu0 }
 0x4c1   :  { %v485_v14 = vmul.f32 %v832_v13, %v1171_v36  ;;  %v475_v15 = vpop.f32.mrb[3].mxu0 }
 0x4c2   :  { %v484_v18 = vmul.f32 %v475_v15, %v1173_v37 }
 0x4c4   :  { %v919_v19 = vpack.c.bf16 %v485_v14, %v484_v18 }
 0x4c6   :  { %920 = vmatprep.subr.bf16.mxu1 %v919_v19 }
 0x4c7   :  { %922 = vmatpush3.bf16.msra.mxu1 %v919_v19 }
 0x4c8   :  { %924 = vmatprep.subr.bf16.mxu1 %v923_v20 }
 0x4ca   :  { %838 = vmatmul.mubr.msk.f32.vlgmr.msra.gmra.mrb[4].mxu1 %vm201_vm11, %v1159_v26  ;;  %v588_v26 = vld [vmem:[#allocation5 + $0x60] sm:$0xff] }
 0x4cb   :  { %926 = vmatpush3.bf16.msra.mxu1 %v923_v20  ;;  %v947_v40 = vpack.c.bf16 %v589_v39, %v588_v26 }
 0x4cc   :  { %928 = vmatprep.subr.bf16.mxu1 %v927_v23 }
 0x4cf   :  { %930 = vmatpush3.bf16.msra.mxu1 %v927_v23 }
 0x4d0   :  { %932 = vmatprep.subr.bf16.mxu1 %v931_v27 }
 0x4d3   :  { %934 = vmatpush3.bf16.msra.mxu1 %v931_v27 }
 0x4d4   :  { %936 = vmatprep.subr.bf16.mxu1 %v935_v30 }
 0x4d7   :  { %938 = vmatpush3.bf16.msra.mxu1 %v935_v30 }
 0x4d8   :  { %940 = vmatprep.subr.bf16.mxu1 %v939_v33 }
 0x4db   :  { %942 = vmatpush3.bf16.msra.mxu1 %v939_v33 }
 0x4dc   :  { %944 = vmatprep.subr.bf16.mxu1 %v943_v38 }
 0x4df   :  { %946 = vmatpush3.bf16.msra.mxu1 %v943_v38 }
 0x4e0   :  { %948 = vmatprep.subr.bf16.mxu1 %v947_v40 }
 0x4e3   :  { %950 = vmatpush3.bf16.msra.mxu1 %v947_v40 }
 0x4e4   :  { %952 = vmatprep.subr.bf16.mxu1 %v951_v43 }
 0x4e7   :  { %954 = vmatpush3.bf16.msra.mxu1 %v951_v43 }
 0x59d   :  { %v839_v44 = vpop.f32.mrb[4].mxu1 }
 0x59e   :  { %v562_v46 = vmul.f32 %v839_v44, %v1171_v36  ;;  %v552_v47 = vpop.f32.mrb[5].mxu1 }
 0x59f   :  { %v561_v48 = vmul.f32 %v552_v47, %v1173_v37 }
 0x5a0   :  { %v571_v49 = vadd.f32 %v720_v45, %v562_v46 }
 0x5a1   :  { %v570_v50 = vadd.f32 %v720_v45, %v561_v48 }
 0x5a2   :  { %973 = vtanh.f32 %v571_v49 }
 0x5a3   :  { %975 = vtanh.f32 %v570_v50 }
 0x5ac   :  { %v974_v51 = vpop.eup %973 }
 0x5ad   :  { %v976_v52 = vpop.eup %975  ;;  %575 = vst [vmem:[#allocation7 + $0x8] sm:$0xff] %v974_v51 }
 0x5ae   :  { %574 = vst [vmem:[#allocation7] sm:$0xff] %v976_v52  ;;  %872 = vmatprep.mubr.f32.mxu1 %v976_v52 }
 0x5af   :  { %873 = vmatmul.mubr.f32.vlgmr.msra.gmra.mrb[6].mxu1 %v974_v51 }
 0x5b0   :  { %1032 = shalt.err (!%p1029_p6)
}
 0x5b1   :  { %s1033_s14 = scalar_lea.hbm %s1230_s9, 256 }
 0x5b2   :  { %p1034_p7 = scmp.ne.s32.totalorder %s1230_s9, %s1033_s14  ;;  %p1037_p8 = scmp.lt.u32.totalorder %s1033_s14, %s1230_s9 }
 0x5b4   :  { %p1039_p9 = pnand %p1037_p8, %p1034_p7 }
 0x5b6   :  { %1042 = shalt.err (!%p1039_p9)
}
 0x5b7   :  { %687 = dma.vmem_to_hbm [thread:$0]  %s682_s16, 256, %s1230_s9, [#allocation4], %s1050_s23, %s1050_s23, %s1051_s24  }
 0x5b8   :  { %v721_v36 = vld [vmem:[%s1229_s8] ss:$0 sm:$0xff] }
 0x682   :  { %v874_v37 = vpop.f32.mrb[6].mxu1 }
 0x683   :  { %v671_v53 = vadd.f32 %v874_v37, %v721_v36  ;;  %v665_v54 = vpop.f32.mrb[7].mxu1 }
 0x684   :  { %v666_v55 = vadd.f32 %v721_v36, %v665_v54 }
 0x685   :  { %675 = vst [vmem:[%s1231_s10 + $0x8] sm:$0xff] %v671_v53 }
 0x686   :  { %674 = vst [vmem:[%s1231_s10] sm:$0xff] %v666_v55 }
 0x687   :  { %1047 = dma.done.wait [#allocation4], 256  }
 0x688   :  { %1048 = vsyncadd [#allocation4], 4294967040 }
 0x689   :  { %695 = vsyncpa [#allocation3], 1 }
 0x68a   :  { %696 = vsyncpa [#allocation6], 1 }
 0x68b   :  { %697 = vsyncpa [#allocation4], 1 }

</bundles_post_ra>
